<compile_context>
chip_gen: v6e
topology: v6e:2x2x1
jax: 0.10.0
libtpu: 0.0.40
codegen_flags: <defaults>
</compile_context>

<pallas_src>
import functools

import numpy as np
import jax
import jax.numpy as jnp
from jax.experimental import pallas as pl
from jax.experimental.pallas import tpu as pltpu


# ---------------------------------------------------------------------------
# Kernels
# ---------------------------------------------------------------------------
def _make_kernel_single(c_x: int, apply_gate: bool):
    """Single fused output: out[:c_x] = x, out[c_x:] = skip * gate.

    Only used when c_x is sublane-aligned so both sliced stores stay unmasked.
    Kernel refs (batch dim squeezed): x (c_x, T), skip (c_s, T), out (c_out, T).
    """

    def kernel(x_ref, s_ref, o_ref):
        x = x_ref[...]
        s = s_ref[...]
        if apply_gate:
            gate = jax.nn.sigmoid(
                jnp.mean(x.astype(jnp.float32), axis=0, keepdims=True))
            s = s * gate.astype(s.dtype)
        o_ref[:c_x, :] = x
        o_ref[c_x:, :] = s

    return kernel


def _make_kernel_split(apply_gate: bool):
    """Two outputs (x passthrough, gated skip); wrapper concatenates."""

    def kernel(x_ref, s_ref, ox_ref, os_ref):
        x = x_ref[...]
        s = s_ref[...]
        if apply_gate:
            gate = jax.nn.sigmoid(
                jnp.mean(x.astype(jnp.float32), axis=0, keepdims=True))
            s = s * gate.astype(s.dtype)
        ox_ref[...] = x
        os_ref[...] = s

    return kernel


# ---------------------------------------------------------------------------
# Tiling heuristics
# ---------------------------------------------------------------------------
def _choose_hw_tile(hw: int, c_x: int, c_s: int, itemsize: int) -> int:
    """Pick a lane tile so double-buffered VMEM footprint stays ~<=16 MiB.

    Prefers a tile that divides hw (avoids wrapper pad/slice HBM copies).
    """
    c_out = c_x + c_s
    budget_bytes = 16 * 1024 * 1024
    per_lane_bytes = 2 * (c_x + c_s + c_out) * itemsize  # x2: double buffering
    tile = budget_bytes // max(per_lane_bytes, 1)
    tile = (tile // 128) * 128
    tile = max(tile, 128)
    tile = min(tile, 4096)           # VMEM headroom cap (v7x has 64 MiB total)
    if tile >= hw:
        return hw                    # full extent: no tiling / padding needed
    if hw % 128 == 0:
        # Prefer the largest multiple-of-128 tile that divides hw exactly.
        blocks = hw // 128
        for mult in range(tile // 128, 0, -1):
            if blocks % mult == 0:
                return mult * 128
    return int(tile)


def _sublane_pack(itemsize: int) -> int:
    # f32 -> 8, bf16 -> 16, int8 -> 32 rows per sublane pack.
    return 8 * max(1, 4 // itemsize)


# ---------------------------------------------------------------------------
# Wrapper
# ---------------------------------------------------------------------------
@functools.partial(jax.jit, static_argnames=("attention_type", "hw_tile"))
def attention_dss(x, skip, attention_type="dss", *, hw_tile=None):
    """x, skip: NCHW arrays. Returns cat([x, skip * gate], dim=1) (NCHW)."""
    if attention_type is None:
        # Pure concat: XLA already runs this at HBM roofline.
        return jnp.concatenate([x, skip], axis=1)

    n, c_x, h, w = x.shape
    n2, c_s, h2, w2 = skip.shape
    assert (n, h, w) == (n2, h2, w2), "x / skip spatial + batch must match"
    hw = h * w
    c_out = c_x + c_s
    itemsize = jnp.dtype(x.dtype).itemsize

    if hw_tile is None:
        hw_tile = _choose_hw_tile(hw, c_x, c_s, itemsize)
    hw_tile = min(int(hw_tile), hw)

    x_f = x.reshape(n, c_x, hw)
    s_f = skip.reshape(n, c_s, hw)

    # Pad the lane axis only if the tile does not divide hw.
    if hw_tile < hw:
        hw_pad = ((hw + hw_tile - 1) // hw_tile) * hw_tile
        if hw_pad != hw:
            pad = hw_pad - hw
            x_f = jnp.pad(x_f, ((0, 0), (0, 0), (0, pad)))
            s_f = jnp.pad(s_f, ((0, 0), (0, 0), (0, pad)))
    else:
        hw_tile = hw
        hw_pad = hw
    t_grid = hw_pad // hw_tile

    grid = (n, t_grid)
    in_specs = [
        pl.BlockSpec((None, c_x, hw_tile), lambda b, t: (b, 0, t)),
        pl.BlockSpec((None, c_s, hw_tile), lambda b, t: (b, 0, t)),
    ]
    compiler_params = pltpu.CompilerParams(
        dimension_semantics=("parallel", "parallel"))

    aligned = (c_x % _sublane_pack(itemsize)) == 0

    if aligned:
        out = pl.pallas_call(
            _make_kernel_single(c_x, apply_gate=True),
            out_shape=jax.ShapeDtypeStruct((n, c_out, hw_pad), x.dtype),
            grid=grid,
            in_specs=in_specs,
            out_specs=pl.BlockSpec((None, c_out, hw_tile),
                                   lambda b, t: (b, 0, t)),
            compiler_params=compiler_params,
        )(x_f, s_f)
        if hw_pad != hw:
            out = out[:, :, :hw]
        return out.reshape(n, c_out, h, w)

    # Unaligned concat boundary: emit two lane-dense outputs and let the
    # wrapper concatenate (keeps every in-kernel store unmasked).  This path
    # only triggers for channel counts that are not multiples of the sublane
    # pack, which is rare for real U-Net++ decoders.
    out_x, out_s = pl.pallas_call(
        _make_kernel_split(apply_gate=True),
        out_shape=(
            jax.ShapeDtypeStruct((n, c_x, hw_pad), x.dtype),
            jax.ShapeDtypeStruct((n, c_s, hw_pad), skip.dtype),
        ),
        grid=grid,
        in_specs=in_specs,
        out_specs=(
            pl.BlockSpec((None, c_x, hw_tile), lambda b, t: (b, 0, t)),
            pl.BlockSpec((None, c_s, hw_tile), lambda b, t: (b, 0, t)),
        ),
        compiler_params=compiler_params,
    )(x_f, s_f)
    if hw_pad != hw:
        out_x = out_x[:, :, :hw]
        out_s = out_s[:, :, :hw]
    out = jnp.concatenate([out_x, out_s], axis=1)
    return out.reshape(n, c_out, h, w)


# ---------------------------------------------------------------------------
# Pure-JAX reference
# ---------------------------------------------------------------------------
def attention_dss_ref(x, skip, attention_type="dss"):
    if attention_type is None:
        return jnp.concatenate([x, skip], axis=1)
    gate = jax.nn.sigmoid(jnp.mean(x.astype(jnp.float32), axis=1,
                                   keepdims=True)).astype(skip.dtype)
    return jnp.concatenate([x, skip * gate], axis=1)


# ---------------------------------------------------------------------------
# Tests
# ---------------------------------------------------------------------------
if __name__ == "__main__":
    key = jax.random.PRNGKey(0)

    def check(out, ref, tol=1e-6):
        np.testing.assert_allclose(np.asarray(out), np.asarray(ref),
                                   rtol=tol, atol=tol)

    # Case 1: c_x=4 (not sublane-aligned -> split-output path), full-extent tile.
    kx, ks, key = jax.random.split(key, 3)
    x = jax.random.normal(kx, (2, 4, 16, 16), dtype=jnp.float32)
    skip = jax.random.normal(ks, (2, 4, 16, 16), dtype=jnp.float32)
    out = jax.block_until_ready(attention_dss(x, skip, attention_type="dss"))
    check(out, attention_dss_ref(x, skip, attention_type="dss"))

    # Case 1b: attention_type=None -> plain concat (no Pallas call).
    out_none = jax.block_until_ready(attention_dss(x, skip, attention_type=None))
    check(out_none, attention_dss_ref(x, skip, attention_type=None))

    # Case 2: c_x=8 (sublane-aligned -> fused single-output path).
    kx, ks, key = jax.random.split(key, 3)
    x2 = jax.random.normal(kx, (2, 8, 16, 16), dtype=jnp.float32)
    s2 = jax.random.normal(ks, (2, 8, 16, 16), dtype=jnp.float32)
    out2 = jax.block_until_ready(attention_dss(x2, s2, attention_type="dss"))
    check(out2, attention_dss_ref(x2, s2, attention_type="dss"))

    # Case 3: lane tiling + padding path (hw=400 -> padded to 512, 4 tiles),
    # fused single-output path (c_x=8 aligned).
    kx, ks, key = jax.random.split(key, 3)
    x3 = jax.random.normal(kx, (1, 8, 20, 20), dtype=jnp.float32)
    s3 = jax.random.normal(ks, (1, 8, 20, 20), dtype=jnp.float32)
    out3 = jax.block_until_ready(
        attention_dss(x3, s3, attention_type="dss", hw_tile=128))
    check(out3, attention_dss_ref(x3, s3, attention_type="dss"))

    # Case 4: larger feature map exercising the auto-chosen divisor tile
    # (hw=4096 divisible by 128 -> no padding, multiple grid steps).
    kx, ks, key = jax.random.split(key, 3)
    x4 = jax.random.normal(kx, (2, 16, 64, 64), dtype=jnp.float32)
    s4 = jax.random.normal(ks, (2, 16, 64, 64), dtype=jnp.float32)
    out4 = jax.block_until_ready(attention_dss(x4, s4, attention_type="dss"))
    check(out4, attention_dss_ref(x4, s4, attention_type="dss"))

    print("KERNEL_OK")
</pallas_src>

<mosaic_0001>
module attributes {stable_mosaic.version = 11 : i64} {
  func.func @kernel(%arg0: i32, %arg1: i32, %arg2: memref<1x4x256xf32, #tpu.memory_space<vmem>>, %arg3: memref<1x4x256xf32, #tpu.memory_space<vmem>>, %arg4: memref<1x4x256xf32, #tpu.memory_space<vmem>>, %arg5: memref<1x4x256xf32, #tpu.memory_space<vmem>>) attributes {dimension_semantics = [#tpu.dimension_semantics<parallel>, #tpu.dimension_semantics<parallel>], iteration_bounds = array<i64: 2, 1>, scalar_prefetch = 0 : i64, scratch_operands = 0 : i64, tpu.core_type = #tpu.core_type<tc>, window_params = [{transform_indices = @transform_0, window_bounds = array<i64: 1, 4, 256>}, {transform_indices = @transform_1, window_bounds = array<i64: 1, 4, 256>}, {transform_indices = @transform_2, window_bounds = array<i64: 1, 4, 256>}, {transform_indices = @transform_3, window_bounds = array<i64: 1, 4, 256>}]} {
    %c0 = arith.constant 0 : index
    %c0_0 = arith.constant 0 : index
    %c0_1 = arith.constant 0 : index
    %0 = vector.load %arg2[%c0, %c0_0, %c0_1] : memref<1x4x256xf32, #tpu.memory_space<vmem>>, vector<1x4x256xf32>
    %1 = vector.shape_cast %0 : vector<1x4x256xf32> to vector<4x256xf32>
    %c0_2 = arith.constant 0 : index
    %c0_3 = arith.constant 0 : index
    %c0_4 = arith.constant 0 : index
    %2 = vector.load %arg3[%c0_2, %c0_3, %c0_4] : memref<1x4x256xf32, #tpu.memory_space<vmem>>, vector<1x4x256xf32>
    %3 = vector.shape_cast %2 : vector<1x4x256xf32> to vector<4x256xf32>
    %cst = arith.constant dense<0.000000e+00> : vector<256xf32>
    %4 = vector.multi_reduction <add>, %1, %cst [0] : vector<4x256xf32> to vector<256xf32>
    %5 = vector.shape_cast %4 : vector<256xf32> to vector<1x256xf32>
    %cst_5 = arith.constant 4.000000e+00 : f32
    %6 = vector.broadcast %cst_5 : f32 to vector<1x256xf32>
    %7 = arith.divf %5, %6 : vector<1x256xf32>
    %8 = arith.negf %7 : vector<1x256xf32>
    %9 = math.exp %8 : vector<1x256xf32>
    %cst_6 = arith.constant 1.000000e+00 : f32
    %10 = vector.broadcast %cst_6 : f32 to vector<1x256xf32>
    %11 = arith.addf %10, %9 : vector<1x256xf32>
    %12 = arith.divf %10, %11 : vector<1x256xf32>
    %13 = vector.broadcast %12 : vector<1x256xf32> to vector<4x256xf32>
    %14 = arith.mulf %3, %13 : vector<4x256xf32>
    %c0_7 = arith.constant 0 : index
    %c0_8 = arith.constant 0 : index
    %c0_9 = arith.constant 0 : index
    %15 = vector.load %arg4[%c0_7, %c0_8, %c0_9] : memref<1x4x256xf32, #tpu.memory_space<vmem>>, vector<1x4x256xf32>
    %16 = vector.shape_cast %15 : vector<1x4x256xf32> to vector<4x256xf32>
    %17 = vector.shape_cast %1 : vector<4x256xf32> to vector<1x4x256xf32>
    tpu.vector_store %arg4[%c0_7, %c0_8, %c0_9], %17 {strides = array<i32>} : memref<1x4x256xf32, #tpu.memory_space<vmem>>, vector<1x4x256xf32>,
    %c0_10 = arith.constant 0 : index
    %c0_11 = arith.constant 0 : index
    %c0_12 = arith.constant 0 : index
    %18 = vector.load %arg5[%c0_10, %c0_11, %c0_12] : memref<1x4x256xf32, #tpu.memory_space<vmem>>, vector<1x4x256xf32>
    %19 = vector.shape_cast %18 : vector<1x4x256xf32> to vector<4x256xf32>
    %20 = vector.shape_cast %14 : vector<4x256xf32> to vector<1x4x256xf32>
    tpu.vector_store %arg5[%c0_10, %c0_11, %c0_12], %20 {strides = array<i32>} : memref<1x4x256xf32, #tpu.memory_space<vmem>>, vector<1x4x256xf32>,
    return
  }
  func.func @transform_0(%arg0: i32, %arg1: i32) -> (i32, i32, i32) {
    %c0_i32 = arith.constant 0 : i32
    %c0_i32_0 = arith.constant 0 : i32
    return %arg0, %c0_i32, %arg1 : i32, i32, i32
  }
  func.func @transform_1(%arg0: i32, %arg1: i32) -> (i32, i32, i32) {
    %c0_i32 = arith.constant 0 : i32
    %c0_i32_0 = arith.constant 0 : i32
    return %arg0, %c0_i32, %arg1 : i32, i32, i32
  }
  func.func @transform_2(%arg0: i32, %arg1: i32) -> (i32, i32, i32) {
    %c0_i32 = arith.constant 0 : i32
    %c0_i32_0 = arith.constant 0 : i32
    return %arg0, %c0_i32, %arg1 : i32, i32, i32
  }
  func.func @transform_3(%arg0: i32, %arg1: i32) -> (i32, i32, i32) {
    %c0_i32 = arith.constant 0 : i32
    %c0_i32_0 = arith.constant 0 : i32
    return %arg0, %c0_i32, %arg1 : i32, i32, i32
  }
}

</mosaic_0001>

<bundles_post_ra>
// kernel: attention_dss.1
= control target key start
LH: loop header
LB: loop body
LE: loop exit
PB: predicated region body
PF: predicated region fallthrough
CT: control target
= control target key end

     0   :  { %s565_s12 = smov 0   ;;  %s567_s13 = smov 0   ;;  %s610_s0 = inlined_call_operand.vmem [shape: f32[2,4,256], index: 0, kind: input, shape index: {}]   ;;  %s611_s1 = inlined_call_operand.vmem [shape: f32[2,4,256], index: 1, kind: input, shape index: {}]   ;;  %s612_s2 = inlined_call_operand.vmem [shape: f32[2,4,256], index: 2, kind: output, shape index: {0}]   ;;  %s613_s3 = inlined_call_operand.vmem [shape: f32[2,4,256], index: 3, kind: output, shape index: {1}]  }
   0x1   :  { %s569_s14 = smov 0  }
   0x2 LB: > { %s26_s15 = sadd.s32 1, %s539_s13  ;;  %p471_p0 = scmp.ge.s32.totalorder %s543_s14, 1  ;;  %s543_s14 = sphi %s569_s14, %s14_s14   ;;  %s539_s13 = sphi %s567_s13, %s615_s13   ;;  %s535_s12 = sphi %s565_s12, %s614_s12  }
   0x3   : > { %p28_p1 = scmp.ge.s32.totalorder %s26_s15, 2  ;;  %p180_p2 = scmp.lt.s32.totalorder %s543_s14, 3 }
   0x5   : > { %s617_s15 = smov (%p28_p1, %s26_s15), 0  ;;  %p181_p3 = pnand %p471_p0, %p180_p2 }
   0x6   : > { %p231_p4 = scmp.lt.s32.totalorder (!%p181_p3), %s535_s12, 1 }
   0x7   : > { %184 = sbr.rel (%p181_p3) target bundleno = 70 (0x46), region = 28 }
   0xc   : > { %s619_s12 = smov (!%p231_p4, %s535_s12), 1  ;;  %vm275_vm0 = vcmask 1043456  }
   0xd   : > { %s583_s16 = sshll.u32 %s619_s12, 3 }
   0xe   : > { %s238_s19 = scalar_lea.vmem %s610_s0, %s583_s16  ;;  %s258_s22 = scalar_lea.vmem %s612_s2, %s583_s16 }
   0xf   : > { %v270_v0 = vld [vmem:[%s238_s19] sm:$0xff]  ;;  %s248_s25 = scalar_lea.vmem %s611_s1, %s583_s16  ;;  %s268_s28 = scalar_lea.vmem %s613_s3, %s583_s16 }
  0x10   : > { %v273_v1 = vcombine.high %v270_v0, %v270_v0  ;;  %v276_v2 = vsel %vm275_vm0, %v270_v0, 0.0  ;;  %310 = vst [vmem:[%s258_s22] sm:$0xff] %v270_v0  ;;  %v271_v26 = vld [vmem:[%s248_s25] sm:$0xff] }
  0x11   : > { %v277_v3 = vrot.slane %v276_v2, 4 }
  0x12   : > { %v283_v4 = vsel %vm275_vm0, %v273_v1, 0.0 }
  0x13   : > { %v278_v5 = vadd.f32 %v277_v3, %v276_v2  ;;  %v284_v6 = vrot.slane %v283_v4, 4 }
  0x15   : > { %v279_v7 = vrot.slane %v278_v5, 2  ;;  %v285_v8 = vadd.f32 %v284_v6, %v283_v4 }
  0x17   : > { %v280_v9 = vadd.f32 %v279_v7, %v278_v5  ;;  %v286_v10 = vrot.slane %v285_v8, 2 }
  0x19   : > { %v281_v11 = vrot.slane %v280_v9, 1  ;;  %v287_v12 = vadd.f32 %v286_v10, %v285_v8 }
  0x1b   : > { %v282_v13 = vadd.f32 %v281_v11, %v280_v9  ;;  %v288_v14 = vrot.slane %v287_v12, 1 }
  0x1d   : > { %v289_v15 = vadd.f32 %v288_v14, %v287_v12  ;;  %v480_v16 = vmul.f32 -0.25, %v282_v13 }
  0x1f   : > { %v481_v17 = vmul.f32 -0.25, %v289_v15  ;;  %v295_v18 = vmul.f32 1.442695, %v480_v16 }
  0x21   : > { %513 = vpow2.f32 %v295_v18  ;;  %v297_v19 = vmul.f32 1.442695, %v481_v17 }
  0x23   : > { %515 = vpow2.f32 %v297_v19 }
  0x2e   : > { %v514_v20 = vpop.eup %513 }
  0x2f   : > { %v299_v21 = vadd.f32 1.0, %v514_v20 }
  0x30   : > { %v516_v22 = vpop.eup %515 }
  0x31   : > { %v300_v23 = vadd.f32 1.0, %v516_v22  ;;  %517 = vrcp.f32 %v299_v21 }
  0x33   : > { %519 = vrcp.f32 %v300_v23 }
  0x3e   : > { %v518_v24 = vpop.eup %517 }
  0x40   : > { %v520_v25 = vpop.eup %519 }
  0x41   : > { %v307_v27 = vcombine.low %v518_v24, %v520_v25 }
  0x43   : > { %v309_v28 = vmul.f32 %v307_v27, %v271_v26 }
  0x45   : > { %311 = vst [vmem:[%s268_s28] sm:$0xff] %v309_v28 }
  0x46 PF: > { %s14_s14 = sadd.s32 1, %s543_s14   ;;  %s614_s12 = smov %s539_s13 }
  0x47   : > { %p11_p5 = scmp.ge.s32.totalorder %s14_s14, 4   ;;  %s615_s13 = smov %s617_s15 }
  0x49   :  { %13 = sbr.rel (!%p11_p5) target bundleno = 2 (0x2), region = 73 }

</bundles_post_ra>
